<compile_context>
chip_gen: v7x
topology: tpu7x:2x2x1
jax: 0.10.0
libtpu: 0.0.40
codegen_flags: <defaults>
</compile_context>

<pallas_src>
import functools
import math

import jax
import jax.numpy as jnp
from jax.experimental import pallas as pl
from jax.experimental.pallas import tpu as pltpu


def get_padding(kernel_size, stride=1, dilation=1, **_):
    if isinstance(kernel_size, (tuple, list)):
        kernel_size = max(kernel_size)
    return (stride - 1 + dilation * (kernel_size - 1)) // 2


def _normalize_ks(ks):
    return (ks, ks) if isinstance(ks, int) else tuple(ks)


# ---------------------------------------------------------------------------
# Fast fused path: stride == 1 and purely temporal kernels (kh, 1).
# ---------------------------------------------------------------------------

def _fused_tconv_kernel(x_ref, w_ref, o_ref, col_ref, *,
                        cin, kh, pad, h, w, h_out, bblk, mxu_dtype):
    """One batch block of the fused grouped temporal conv.

    x_ref  : (Bblk, Cin, H*W)            flattened (time, electrode) per trial
    w_ref  : (Cout_total, Cin*kh + 1)    fused 2-D weight, bias as last column
    o_ref  : (Bblk, Cout_total, H_out*W) lane-dense output slab
    col_ref: (Cin*kh + 1, Bblk*H_out*W)  im2col scratch (last row = ones)
    """
    l1 = h_out * w
    k = kh * cin

    # Re-init every step: boundary (zero-pad) lanes + bias row of ones.
    col_ref[...] = jnp.zeros_like(col_ref)
    col_ref[k:k + 1, :] = jnp.ones((1, bblk * l1), col_ref.dtype)

    # im2col fill: one contiguous lane-slice copy per (tap, batch element).
    # H zero-padding is handled by simply not writing out-of-range lanes.
    for dh in range(kh):
        ho_lo = max(0, pad - dh)
        ho_hi = min(h_out, h + pad - dh)
        if ho_hi <= ho_lo:
            continue
        n_lanes = (ho_hi - ho_lo) * w
        src_lo = (ho_lo + dh - pad) * w
        for b in range(bblk):
            dst_lo = b * l1 + ho_lo * w
            col_ref[dh * cin:(dh + 1) * cin, dst_lo:dst_lo + n_lanes] = (
                x_ref[b, :, src_lo:src_lo + n_lanes])

    wmat = w_ref[...]
    col = col_ref[...]
    if mxu_dtype is not None:          # bf16 MXU operands (v6e/v7x option)
        wmat = wmat.astype(mxu_dtype)
        col = col.astype(mxu_dtype)
    acc = jnp.dot(wmat, col, preferred_element_type=jnp.float32)
    for b in range(bblk):              # lane-dense (Cout_total, H_out*W) stores
        o_ref[b] = acc[:, b * l1:(b + 1) * l1].astype(o_ref.dtype)


def fused_group_temporal_conv(x, wmat_b, *, kh_max, pad_max, cout_total,
                              batch_block=None, mxu_dtype=None):
    """All conv groups in one pallas_call; returns (N, Cout_total, H_out, W)."""
    n, cin, h, w = x.shape
    h_out = h + 2 * pad_max - kh_max + 1
    l1 = h_out * w
    k1 = kh_max * cin + 1

    if batch_block is None:
        # Fold enough batch elements into the lane dim for a meaty grid step.
        target = max(1, -(-512 // l1))
        batch_block = 1
        for d in range(1, n + 1):
            if n % d == 0 and d <= target:
                batch_block = d
    grid = (n // batch_block,)

    x_flat = x.reshape(n, cin, h * w)            # free (contiguous) reshape

    kernel = functools.partial(
        _fused_tconv_kernel, cin=cin, kh=kh_max, pad=pad_max, h=h, w=w,
        h_out=h_out, bblk=batch_block, mxu_dtype=mxu_dtype)

    out = pl.pallas_call(
        kernel,
        out_shape=jax.ShapeDtypeStruct((n, cout_total, l1), x.dtype),
        grid_spec=pltpu.PrefetchScalarGridSpec(
            num_scalar_prefetch=0,
            grid=grid,
            in_specs=[
                pl.BlockSpec((batch_block, cin, h * w), lambda i: (i, 0, 0)),
                pl.BlockSpec((cout_total, k1), lambda i: (0, 0)),
            ],
            out_specs=pl.BlockSpec((batch_block, cout_total, l1),
                                   lambda i: (i, 0, 0)),
            scratch_shapes=[pltpu.VMEM((k1, batch_block * l1), x.dtype)],
        ),
        compiler_params=pltpu.CompilerParams(
            dimension_semantics=("parallel",)),
    )(x_flat, wmat_b)
    return out.reshape(n, cout_total, h_out, w)   # free reshape


# ---------------------------------------------------------------------------
# General fallback (square kernels or stride > 1): per-group conv with
# per-tap MXU accumulation.  Correct but not layout-optimized.
# TODO(synk): extend the fused lane-dense im2col path to stride > 1 / kw > 1.
# ---------------------------------------------------------------------------

def _conv_group_kernel(x_ref, w_ref, b_ref, o_ref, *, kh, kw, stride, h_out, w_out):
    x = x_ref[0]                       # (Cin, Hp, W)
    c_out = o_ref.shape[1]
    acc = jnp.zeros((c_out, h_out, w_out), jnp.float32)
    for dh in range(kh):
        for dw in range(kw):
            xs = x[:, dh:dh + stride * h_out:stride, dw:dw + stride * w_out:stride]
            wk = w_ref[:, :, dh, dw]
            acc = acc + jax.lax.dot_general(
                wk.astype(jnp.float32), xs.astype(jnp.float32),
                (((1,), (0,)), ((), ())), preferred_element_type=jnp.float32)
    acc = acc + b_ref[...][:, :, None]
    o_ref[0] = acc.astype(o_ref.dtype)


def conv2d_height_padded_pallas(x, w, b, kernel_size_spec, stride):
    n, c_in, h, width = x.shape
    c_out, _, kh, kw = w.shape
    pad_h = get_padding(kernel_size_spec, stride)
    x_pad = jnp.pad(x, ((0, 0), (0, 0), (pad_h, pad_h), (0, 0)))
    hp = h + 2 * pad_h
    h_out = (hp - kh) // stride + 1
    w_out = (width - kw) // stride + 1
    b2 = b.reshape(c_out, 1)
    kernel = functools.partial(_conv_group_kernel, kh=kh, kw=kw, stride=stride,
                               h_out=h_out, w_out=w_out)
    return pl.pallas_call(
        kernel,
        out_shape=jax.ShapeDtypeStruct((n, c_out, h_out, w_out), x.dtype),
        grid_spec=pltpu.PrefetchScalarGridSpec(
            num_scalar_prefetch=0,
            grid=(n,),
            in_specs=[
                pl.BlockSpec((1, c_in, hp, width), lambda i: (i, 0, 0, 0)),
                pl.BlockSpec((c_out, c_in, kh, kw), lambda i: (0, 0, 0, 0)),
                pl.BlockSpec((c_out, 1), lambda i: (0, 0)),
            ],
            out_specs=pl.BlockSpec((1, c_out, h_out, w_out),
                                   lambda i: (i, 0, 0, 0)),
        ),
        compiler_params=pltpu.CompilerParams(dimension_semantics=("parallel",)),
    )(x_pad, w, b2)


# ---------------------------------------------------------------------------
# Module wrapper
# ---------------------------------------------------------------------------

class GroupTemporalFilterPallas:
    """JAX/Pallas port of LibEER's group_temporal_filter."""

    def __init__(self, n_filterbank, n_filters_time, kernel_size_group,
                 stride_size=1, key=None, mxu_dtype=None):
        # mxu_dtype: pass jnp.bfloat16 on v6e/v7x for bf16-native MXU operands
        # (accumulation stays f32); default None keeps everything f32.
        self.n_filterbank = n_filterbank
        self.n_filters_time = n_filters_time
        self.kernel_size_group = (kernel_size_group
                                  if isinstance(kernel_size_group, list)
                                  else [kernel_size_group])
        self.n_group = len(self.kernel_size_group)
        self.stride_size = stride_size
        self.mxu_dtype = mxu_dtype
        if key is None:
            key = jax.random.PRNGKey(0)

        self.params = []
        for ks in self.kernel_size_group:
            kh, kw = _normalize_ks(ks)
            key, wkey = jax.random.split(key)
            fan_in = n_filterbank * kh * kw
            fan_out = n_filters_time * kh * kw
            bound = math.sqrt(6.0 / (fan_in + fan_out))       # xavier_uniform
            wgt = jax.random.uniform(wkey, (n_filters_time, n_filterbank, kh, kw),
                                     jnp.float32, minval=-bound, maxval=bound)
            bias = jnp.zeros((n_filters_time,), jnp.float32)  # constant_(bias, 0)
            self.params.append((ks, wgt, bias))

        # Fused fast path: stride 1 and purely temporal (kh, 1) kernels whose
        # padded output heights agree (the torch.cat in the reference module
        # requires the latter anyway).  NOTE: even kernel sizes intentionally
        # use (k-1)//2 padding (PyTorch-matching), which shifts H_out.
        norm = [_normalize_ks(ks) for ks in self.kernel_size_group]
        pads = [get_padding(ks, stride_size) for ks in self.kernel_size_group]
        self._fused = (
            stride_size == 1
            and all(kw == 1 for _, kw in norm)
            and len({2 * p - kh for p, (kh, _) in zip(pads, norm)}) == 1)
        if self._fused:
            self.kh_max = max(kh for kh, _ in norm)
            self.pad_max = get_padding((self.kh_max, 1), stride_size)
            self.cout_total = self.n_group * n_filters_time
            blocks, biases = [], []
            for (ks, wgt, bias), (kh, _), pad_g in zip(self.params, norm, pads):
                off = self.pad_max - pad_g        # embed into common tap window
                wf = jnp.zeros((n_filters_time, n_filterbank, self.kh_max),
                               jnp.float32)
                wf = wf.at[:, :, off:off + kh].set(wgt[:, :, :, 0])
                blocks.append(wf)
                biases.append(bias)
            w_all = jnp.concatenate(blocks, axis=0)   # (Cout_total, Cin, kh_max)
            # 2-D weight with K ordering (dh, ci), matching the im2col fill.
            wmat = jnp.transpose(w_all, (0, 2, 1)).reshape(
                self.cout_total, self.kh_max * n_filterbank)
            bias_all = jnp.concatenate(biases, axis=0)
            self.wmat_b = jnp.concatenate([wmat, bias_all[:, None]], axis=1)

    def __call__(self, x):
        if self._fused:
            return fused_group_temporal_conv(
                x, self.wmat_b, kh_max=self.kh_max, pad_max=self.pad_max,
                cout_total=self.cout_total, mxu_dtype=self.mxu_dtype)
        ys = [conv2d_height_padded_pallas(x, w, b, ks, self.stride_size)
              for (ks, w, b) in self.params]
        return jnp.concatenate(ys, axis=1)


def _reference(module, x):
    """Plain-JAX reference (lax conv) for correctness checking."""
    outs = []
    for (ks, w, b) in module.params:
        pad_h = get_padding(ks, module.stride_size)
        y = jax.lax.conv_general_dilated(
            x, w, (module.stride_size, module.stride_size),
            [(pad_h, pad_h), (0, 0)],
            dimension_numbers=("NCHW", "OIHW", "NCHW"))
        outs.append(y + b[None, :, None, None])
    return jnp.concatenate(outs, axis=1)


if __name__ == "__main__":
    # Small FBSTCNet-like shapes: N=2 trials, n_filterbank=4, time=16, electrodes=8.
    N, C_IN, H, W = 2, 4, 16, 8
    N_FILTERS_TIME = 8
    KERNEL_SIZE_GROUP = [(5, 1), (9, 1)]     # temporal kernels along the time axis

    key = jax.random.PRNGKey(0)
    xkey, pkey = jax.random.split(key)
    x = jax.random.normal(xkey, (N, C_IN, H, W), jnp.float32)

    module = GroupTemporalFilterPallas(
        n_filterbank=C_IN,
        n_filters_time=N_FILTERS_TIME,
        kernel_size_group=KERNEL_SIZE_GROUP,
        stride_size=1,
        key=pkey,
    )

    y = jax.block_until_ready(module(x))
    y_ref = jax.block_until_ready(_reference(module, x))

    assert y.shape == (N, len(KERNEL_SIZE_GROUP) * N_FILTERS_TIME, H, W), y.shape
    err = float(jnp.max(jnp.abs(y - y_ref)))
    assert jnp.allclose(y, y_ref, atol=1e-5, rtol=1e-5), err

    print("KERNEL_OK")
</pallas_src>

<mosaic_0001>
module attributes {stable_mosaic.version = 11 : i64} {
  func.func @_fused_tconv_kernel(%arg0: i32, %arg1: memref<2x4x128xf32, #tpu.memory_space<vmem>>, %arg2: memref<16x37xf32, #tpu.memory_space<vmem>>, %arg3: memref<2x16x128xf32, #tpu.memory_space<vmem>>, %arg4: memref<37x256xf32, #tpu.memory_space<vmem>>) attributes {dimension_semantics = [#tpu.dimension_semantics<parallel>], iteration_bounds = array<i64: 1>, scalar_prefetch = 0 : i64, scratch_operands = 1 : i64, tpu.core_type = #tpu.core_type<tc>, window_params = [{transform_indices = @transform_0, window_bounds = array<i64: 2, 4, 128>}, {pipeline_mode = #tpu.pipeline_mode<synchronous>, transform_indices = @transform_1, window_bounds = array<i64: 16, 37>}, {transform_indices = @transform_2, window_bounds = array<i64: 2, 16, 128>}]} {
    %cst = arith.constant 0.000000e+00 : f32
    %0 = vector.broadcast %cst : f32 to vector<37x256xf32>
    %c0 = arith.constant 0 : index
    %c0_0 = arith.constant 0 : index
    %1 = vector.load %arg4[%c0, %c0_0] : memref<37x256xf32, #tpu.memory_space<vmem>>, vector<37x256xf32>
    tpu.vector_store %arg4[%c0, %c0_0], %0 {strides = array<i32>} : memref<37x256xf32, #tpu.memory_space<vmem>>, vector<37x256xf32>,
    %cst_1 = arith.constant 1.000000e+00 : f32
    %2 = vector.broadcast %cst_1 : f32 to vector<1x256xf32>
    %c36 = arith.constant 36 : index
    %c0_2 = arith.constant 0 : index
    %3 = vector.load %arg4[%c36, %c0_2] : memref<37x256xf32, #tpu.memory_space<vmem>>, vector<1x256xf32>
    tpu.vector_store %arg4[%c36, %c0_2], %2 {strides = array<i32>} : memref<37x256xf32, #tpu.memory_space<vmem>>, vector<1x256xf32>,
    %c0_3 = arith.constant 0 : index
    %c0_4 = arith.constant 0 : index
    %c0_5 = arith.constant 0 : index
    %4 = vector.load %arg1[%c0_3, %c0_4, %c0_5] : memref<2x4x128xf32, #tpu.memory_space<vmem>>, vector<1x4x96xf32>
    %5 = vector.shape_cast %4 : vector<1x4x96xf32> to vector<4x96xf32>
    %c0_6 = arith.constant 0 : index
    %c32 = arith.constant 32 : index
    %6 = vector.load %arg4[%c0_6, %c32] : memref<37x256xf32, #tpu.memory_space<vmem>>, vector<4x96xf32>
    tpu.vector_store %arg4[%c0_6, %c32], %5 {strides = array<i32>} : memref<37x256xf32, #tpu.memory_space<vmem>>, vector<4x96xf32>,
    %c1 = arith.constant 1 : index
    %c0_7 = arith.constant 0 : index
    %c0_8 = arith.constant 0 : index
    %7 = vector.load %arg1[%c1, %c0_7, %c0_8] : memref<2x4x128xf32, #tpu.memory_space<vmem>>, vector<1x4x96xf32>
    %8 = vector.shape_cast %7 : vector<1x4x96xf32> to vector<4x96xf32>
    %c0_9 = arith.constant 0 : index
    %c160 = arith.constant 160 : index
    %9 = vector.load %arg4[%c0_9, %c160] : memref<37x256xf32, #tpu.memory_space<vmem>>, vector<4x96xf32>
    tpu.vector_store %arg4[%c0_9, %c160], %8 {strides = array<i32>} : memref<37x256xf32, #tpu.memory_space<vmem>>, vector<4x96xf32>,
    %c0_10 = arith.constant 0 : index
    %c0_11 = arith.constant 0 : index
    %c0_12 = arith.constant 0 : index
    %10 = vector.load %arg1[%c0_10, %c0_11, %c0_12] : memref<2x4x128xf32, #tpu.memory_space<vmem>>, vector<1x4x104xf32>
    %11 = vector.shape_cast %10 : vector<1x4x104xf32> to vector<4x104xf32>
    %c4 = arith.constant 4 : index
    %c24 = arith.constant 24 : index
    %12 = vector.load %arg4[%c4, %c24] : memref<37x256xf32, #tpu.memory_space<vmem>>, vector<4x104xf32>
    tpu.vector_store %arg4[%c4, %c24], %11 {strides = array<i32>} : memref<37x256xf32, #tpu.memory_space<vmem>>, vector<4x104xf32>,
    %c1_13 = arith.constant 1 : index
    %c0_14 = arith.constant 0 : index
    %c0_15 = arith.constant 0 : index
    %13 = vector.load %arg1[%c1_13, %c0_14, %c0_15] : memref<2x4x128xf32, #tpu.memory_space<vmem>>, vector<1x4x104xf32>
    %14 = vector.shape_cast %13 : vector<1x4x104xf32> to vector<4x104xf32>
    %c4_16 = arith.constant 4 : index
    %c152 = arith.constant 152 : index
    %15 = vector.load %arg4[%c4_16, %c152] : memref<37x256xf32, #tpu.memory_space<vmem>>, vector<4x104xf32>
    tpu.vector_store %arg4[%c4_16, %c152], %14 {strides = array<i32>} : memref<37x256xf32, #tpu.memory_space<vmem>>, vector<4x104xf32>,
    %c0_17 = arith.constant 0 : index
    %c0_18 = arith.constant 0 : index
    %c0_19 = arith.constant 0 : index
    %16 = vector.load %arg1[%c0_17, %c0_18, %c0_19] : memref<2x4x128xf32, #tpu.memory_space<vmem>>, vector<1x4x112xf32>
    %17 = vector.shape_cast %16 : vector<1x4x112xf32> to vector<4x112xf32>
    %c8 = arith.constant 8 : index
    %c16 = arith.constant 16 : index
    %18 = vector.load %arg4[%c8, %c16] : memref<37x256xf32, #tpu.memory_space<vmem>>, vector<4x112xf32>
    tpu.vector_store %arg4[%c8, %c16], %17 {strides = array<i32>} : memref<37x256xf32, #tpu.memory_space<vmem>>, vector<4x112xf32>,
    %c1_20 = arith.constant 1 : index
    %c0_21 = arith.constant 0 : index
    %c0_22 = arith.constant 0 : index
    %19 = vector.load %arg1[%c1_20, %c0_21, %c0_22] : memref<2x4x128xf32, #tpu.memory_space<vmem>>, vector<1x4x112xf32>
    %20 = vector.shape_cast %19 : vector<1x4x112xf32> to vector<4x112xf32>
    %c8_23 = arith.constant 8 : index
    %c144 = arith.constant 144 : index
    %21 = vector.load %arg4[%c8_23, %c144] : memref<37x256xf32, #tpu.memory_space<vmem>>, vector<4x112xf32>
    tpu.vector_store %arg4[%c8_23, %c144], %20 {strides = array<i32>} : memref<37x256xf32, #tpu.memory_space<vmem>>, vector<4x112xf32>,
    %c0_24 = arith.constant 0 : index
    %c0_25 = arith.constant 0 : index
    %c0_26 = arith.constant 0 : index
    %22 = vector.load %arg1[%c0_24, %c0_25, %c0_26] : memref<2x4x128xf32, #tpu.memory_space<vmem>>, vector<1x4x120xf32>
    %23 = vector.shape_cast %22 : vector<1x4x120xf32> to vector<4x120xf32>
    %c12 = arith.constant 12 : index
    %c8_27 = arith.constant 8 : index
    %24 = vector.load %arg4[%c12, %c8_27] : memref<37x256xf32, #tpu.memory_space<vmem>>, vector<4x120xf32>
    tpu.vector_store %arg4[%c12, %c8_27], %23 {strides = array<i32>} : memref<37x256xf32, #tpu.memory_space<vmem>>, vector<4x120xf32>,
    %c1_28 = arith.constant 1 : index
    %c0_29 = arith.constant 0 : index
    %c0_30 = arith.constant 0 : index
    %25 = vector.load %arg1[%c1_28, %c0_29, %c0_30] : memref<2x4x128xf32, #tpu.memory_space<vmem>>, vector<1x4x120xf32>
    %26 = vector.shape_cast %25 : vector<1x4x120xf32> to vector<4x120xf32>
    %c12_31 = arith.constant 12 : index
    %c136 = arith.constant 136 : index
    %27 = vector.load %arg4[%c12_31, %c136] : memref<37x256xf32, #tpu.memory_space<vmem>>, vector<4x120xf32>
    tpu.vector_store %arg4[%c12_31, %c136], %26 {strides = array<i32>} : memref<37x256xf32, #tpu.memory_space<vmem>>, vector<4x120xf32>,
    %c0_32 = arith.constant 0 : index
    %c0_33 = arith.constant 0 : index
    %c0_34 = arith.constant 0 : index
    %28 = vector.load %arg1[%c0_32, %c0_33, %c0_34] : memref<2x4x128xf32, #tpu.memory_space<vmem>>, vector<1x4x128xf32>
    %29 = vector.shape_cast %28 : vector<1x4x128xf32> to vector<4x128xf32>
    %c16_35 = arith.constant 16 : index
    %c0_36 = arith.constant 0 : index
    %30 = vector.load %arg4[%c16_35, %c0_36] : memref<37x256xf32, #tpu.memory_space<vmem>>, vector<4x128xf32>
    tpu.vector_store %arg4[%c16_35, %c0_36], %29 {strides = array<i32>} : memref<37x256xf32, #tpu.memory_space<vmem>>, vector<4x128xf32>,
    %c1_37 = arith.constant 1 : index
    %c0_38 = arith.constant 0 : index
    %c0_39 = arith.constant 0 : index
    %31 = vector.load %arg1[%c1_37, %c0_38, %c0_39] : memref<2x4x128xf32, #tpu.memory_space<vmem>>, vector<1x4x128xf32>
    %32 = vector.shape_cast %31 : vector<1x4x128xf32> to vector<4x128xf32>
    %c16_40 = arith.constant 16 : index
    %c128 = arith.constant 128 : index
    %33 = vector.load %arg4[%c16_40, %c128] : memref<37x256xf32, #tpu.memory_space<vmem>>, vector<4x128xf32>
    tpu.vector_store %arg4[%c16_40, %c128], %32 {strides = array<i32>} : memref<37x256xf32, #tpu.memory_space<vmem>>, vector<4x128xf32>,
    %c0_41 = arith.constant 0 : index
    %c0_42 = arith.constant 0 : index
    %c8_43 = arith.constant 8 : index
    %34 = vector.load %arg1[%c0_41, %c0_42, %c8_43] : memref<2x4x128xf32, #tpu.memory_space<vmem>>, vector<1x4x120xf32>
    %35 = vector.shape_cast %34 : vector<1x4x120xf32> to vector<4x120xf32>
    %c20 = arith.constant 20 : index
    %c0_44 = arith.constant 0 : index
    %36 = vector.load %arg4[%c20, %c0_44] : memref<37x256xf32, #tpu.memory_space<vmem>>, vector<4x120xf32>
    tpu.vector_store %arg4[%c20, %c0_44], %35 {strides = array<i32>} : memref<37x256xf32, #tpu.memory_space<vmem>>, vector<4x120xf32>,
    %c1_45 = arith.constant 1 : index
    %c0_46 = arith.constant 0 : index
    %c8_47 = arith.constant 8 : index
    %37 = vector.load %arg1[%c1_45, %c0_46, %c8_47] : memref<2x4x128xf32, #tpu.memory_space<vmem>>, vector<1x4x120xf32>
    %38 = vector.shape_cast %37 : vector<1x4x120xf32> to vector<4x120xf32>
    %c20_48 = arith.constant 20 : index
    %c128_49 = arith.constant 128 : index
    %39 = vector.load %arg4[%c20_48, %c128_49] : memref<37x256xf32, #tpu.memory_space<vmem>>, vector<4x120xf32>
    tpu.vector_store %arg4[%c20_48, %c128_49], %38 {strides = array<i32>} : memref<37x256xf32, #tpu.memory_space<vmem>>, vector<4x120xf32>,
    %c0_50 = arith.constant 0 : index
    %c0_51 = arith.constant 0 : index
    %c16_52 = arith.constant 16 : index
    %40 = vector.load %arg1[%c0_50, %c0_51, %c16_52] : memref<2x4x128xf32, #tpu.memory_space<vmem>>, vector<1x4x112xf32>
    %41 = vector.shape_cast %40 : vector<1x4x112xf32> to vector<4x112xf32>
    %c24_53 = arith.constant 24 : index
    %c0_54 = arith.constant 0 : index
    %42 = vector.load %arg4[%c24_53, %c0_54] : memref<37x256xf32, #tpu.memory_space<vmem>>, vector<4x112xf32>
    tpu.vector_store %arg4[%c24_53, %c0_54], %41 {strides = array<i32>} : memref<37x256xf32, #tpu.memory_space<vmem>>, vector<4x112xf32>,
    %c1_55 = arith.constant 1 : index
    %c0_56 = arith.constant 0 : index
    %c16_57 = arith.constant 16 : index
    %43 = vector.load %arg1[%c1_55, %c0_56, %c16_57] : memref<2x4x128xf32, #tpu.memory_space<vmem>>, vector<1x4x112xf32>
    %44 = vector.shape_cast %43 : vector<1x4x112xf32> to vector<4x112xf32>
    %c24_58 = arith.constant 24 : index
    %c128_59 = arith.constant 128 : index
    %45 = vector.load %arg4[%c24_58, %c128_59] : memref<37x256xf32, #tpu.memory_space<vmem>>, vector<4x112xf32>
    tpu.vector_store %arg4[%c24_58, %c128_59], %44 {strides = array<i32>} : memref<37x256xf32, #tpu.memory_space<vmem>>, vector<4x112xf32>,
    %c0_60 = arith.constant 0 : index
    %c0_61 = arith.constant 0 : index
    %c24_62 = arith.constant 24 : index
    %46 = vector.load %arg1[%c0_60, %c0_61, %c24_62] : memref<2x4x128xf32, #tpu.memory_space<vmem>>, vector<1x4x104xf32>
    %47 = vector.shape_cast %46 : vector<1x4x104xf32> to vector<4x104xf32>
    %c28 = arith.constant 28 : index
    %c0_63 = arith.constant 0 : index
    %48 = vector.load %arg4[%c28, %c0_63] : memref<37x256xf32, #tpu.memory_space<vmem>>, vector<4x104xf32>
    tpu.vector_store %arg4[%c28, %c0_63], %47 {strides = array<i32>} : memref<37x256xf32, #tpu.memory_space<vmem>>, vector<4x104xf32>,
    %c1_64 = arith.constant 1 : index
    %c0_65 = arith.constant 0 : index
    %c24_66 = arith.constant 24 : index
    %49 = vector.load %arg1[%c1_64, %c0_65, %c24_66] : memref<2x4x128xf32, #tpu.memory_space<vmem>>, vector<1x4x104xf32>
    %50 = vector.shape_cast %49 : vector<1x4x104xf32> to vector<4x104xf32>
    %c28_67 = arith.constant 28 : index
    %c128_68 = arith.constant 128 : index
    %51 = vector.load %arg4[%c28_67, %c128_68] : memref<37x256xf32, #tpu.memory_space<vmem>>, vector<4x104xf32>
    tpu.vector_store %arg4[%c28_67, %c128_68], %50 {strides = array<i32>} : memref<37x256xf32, #tpu.memory_space<vmem>>, vector<4x104xf32>,
    %c0_69 = arith.constant 0 : index
    %c0_70 = arith.constant 0 : index
    %c32_71 = arith.constant 32 : index
    %52 = vector.load %arg1[%c0_69, %c0_70, %c32_71] : memref<2x4x128xf32, #tpu.memory_space<vmem>>, vector<1x4x96xf32>
    %53 = vector.shape_cast %52 : vector<1x4x96xf32> to vector<4x96xf32>
    %c32_72 = arith.constant 32 : index
    %c0_73 = arith.constant 0 : index
    %54 = vector.load %arg4[%c32_72, %c0_73] : memref<37x256xf32, #tpu.memory_space<vmem>>, vector<4x96xf32>
    tpu.vector_store %arg4[%c32_72, %c0_73], %53 {strides = array<i32>} : memref<37x256xf32, #tpu.memory_space<vmem>>, vector<4x96xf32>,
    %c1_74 = arith.constant 1 : index
    %c0_75 = arith.constant 0 : index
    %c32_76 = arith.constant 32 : index
    %55 = vector.load %arg1[%c1_74, %c0_75, %c32_76] : memref<2x4x128xf32, #tpu.memory_space<vmem>>, vector<1x4x96xf32>
    %56 = vector.shape_cast %55 : vector<1x4x96xf32> to vector<4x96xf32>
    %c32_77 = arith.constant 32 : index
    %c128_78 = arith.constant 128 : index
    %57 = vector.load %arg4[%c32_77, %c128_78] : memref<37x256xf32, #tpu.memory_space<vmem>>, vector<4x96xf32>
    tpu.vector_store %arg4[%c32_77, %c128_78], %56 {strides = array<i32>} : memref<37x256xf32, #tpu.memory_space<vmem>>, vector<4x96xf32>,
    %c0_79 = arith.constant 0 : index
    %c0_80 = arith.constant 0 : index
    %58 = vector.load %arg2[%c0_79, %c0_80] : memref<16x37xf32, #tpu.memory_space<vmem>>, vector<16x37xf32>
    %c0_81 = arith.constant 0 : index
    %c0_82 = arith.constant 0 : index
    %59 = vector.load %arg4[%c0_81, %c0_82] : memref<37x256xf32, #tpu.memory_space<vmem>>, vector<37x256xf32>
    %cst_83 = arith.constant dense<0.000000e+00> : vector<16x256xf32>
    %60 = tpu.matmul %58, %59, %cst_83 {dimension_numbers = #tpu.dot_dimension_numbers<[1], [0], [0], [1], [0, 0, 1, 1], [], []>} : vector<16x37xf32>, vector<37x256xf32>, vector<16x256xf32> -> vector<16x256xf32>
    %61 = vector.extract_strided_slice %60 {offsets = [0, 0], sizes = [16, 128], strides = [1, 1]} : vector<16x256xf32> to vector<16x128xf32>
    %c0_84 = arith.constant 0 : index
    %c0_85 = arith.constant 0 : index
    %c0_86 = arith.constant 0 : index
    %62 = vector.load %arg3[%c0_84, %c0_85, %c0_86] : memref<2x16x128xf32, #tpu.memory_space<vmem>>, vector<1x16x128xf32>
    %63 = vector.shape_cast %62 : vector<1x16x128xf32> to vector<16x128xf32>
    %64 = vector.shape_cast %61 : vector<16x128xf32> to vector<1x16x128xf32>
    tpu.vector_store %arg3[%c0_84, %c0_85, %c0_86], %64 {strides = array<i32>} : memref<2x16x128xf32, #tpu.memory_space<vmem>>, vector<1x16x128xf32>,
    %65 = vector.extract_strided_slice %60 {offsets = [0, 128], sizes = [16, 128], strides = [1, 1]} : vector<16x256xf32> to vector<16x128xf32>
    %c1_87 = arith.constant 1 : index
    %c0_88 = arith.constant 0 : index
    %c0_89 = arith.constant 0 : index
    %66 = vector.load %arg3[%c1_87, %c0_88, %c0_89] : memref<2x16x128xf32, #tpu.memory_space<vmem>>, vector<1x16x128xf32>
    %67 = vector.shape_cast %66 : vector<1x16x128xf32> to vector<16x128xf32>
    %68 = vector.shape_cast %65 : vector<16x128xf32> to vector<1x16x128xf32>
    tpu.vector_store %arg3[%c1_87, %c0_88, %c0_89], %68 {strides = array<i32>} : memref<2x16x128xf32, #tpu.memory_space<vmem>>, vector<1x16x128xf32>,
    return
  }
  func.func @transform_0(%arg0: i32) -> (i32, i32, i32) {
    %c0_i32 = arith.constant 0 : i32
    %c0_i32_0 = arith.constant 0 : i32
    %c0_i32_1 = arith.constant 0 : i32
    return %arg0, %c0_i32, %c0_i32_0 : i32, i32, i32
  }
  func.func @transform_1(%arg0: i32) -> (i32, i32) {
    %c0_i32 = arith.constant 0 : i32
    %c0_i32_0 = arith.constant 0 : i32
    %c0_i32_1 = arith.constant 0 : i32
    return %c0_i32, %c0_i32_0 : i32, i32
  }
  func.func @transform_2(%arg0: i32) -> (i32, i32, i32) {
    %c0_i32 = arith.constant 0 : i32
    %c0_i32_0 = arith.constant 0 : i32
    %c0_i32_1 = arith.constant 0 : i32
    return %arg0, %c0_i32, %c0_i32_0 : i32, i32, i32
  }
}

</mosaic_0001>

<bundles_post_ra>
// kernel: tpu_custom_call.1
= control target key start
LH: loop header
LB: loop body
LE: loop exit
PB: predicated region body
PF: predicated region fallthrough
CT: control target
= control target key end

     0   :  { %7 = vsyncpa [#allocation4], 0  ;;  %s485_s0 = inlined_call_operand.hbm [shape: f32[2,4,128], index: 0, kind: input, shape index: {}]   ;;  %s486_s1 = inlined_call_operand.hbm [shape: f32[16,37], index: 1, kind: input, shape index: {}]   ;;  %s487_s2 = inlined_call_operand.hbm [shape: f32[2,16,128], index: 2, kind: output, shape index: {}]  }
   0x1   :  { %8 = vsyncpa [#allocation7], 0 }
   0x2   :  { %9 = vsyncpa [#allocation5], 0  ;;  %s406_s9 = smov [#allocation3]   ;;  %s334_s13 = scalar_lea.hbm %s485_s0, 128 }
   0x3   :  { %s15_s10 = sshll.u32 %s406_s9, 4  ;;  %p335_p0 = scmp.ne.s32.totalorder %s485_s0, %s334_s13  ;;  %s16_s10 = int_to_ptr.vmem [resolvable:$true] %s15_s10 }
   0x4   :  { %p338_p1 = scmp.lt.u32.totalorder %s334_s13, %s485_s0 }
   0x6   :  { %p340_p2 = pnand %p338_p1, %p335_p0 }
   0x8   :  { %343 = shalt.err (!%p340_p2)
}
   0x9   :  { %s344_s18 = scalar_lea.vmem %s16_s10, 128  ;;  %p349_p4 = scmp.lt.s32.totalorder %s16_s10, %s16_s10 }
   0xa   :  { %p345_p3 = scmp.ne.s32.totalorder %s16_s10, %s344_s18  ;;  %p350_p5 = scmp.lt.s32.totalorder %s344_s18, %s344_s18 }
   0xc   :  { %p351_p6 = por %p350_p5, %p349_p4 }
   0xe   :  { %p352_p7 = pnand %p351_p6, %p345_p3 }
  0x10   :  { %355 = shalt.err (!%p352_p7)
}
  0x11   :  { %s407_s19 = smov 64   ;;  %s408_s20 = smov 4  }
  0x12   :  { %21 = dma.hbm_to_vmem [thread:$0]  %s485_s0, 128, %s16_s10, [#allocation4], %s407_s19, %s407_s19, %s408_s20  }
  0x13   :  { %s409_s23 = smov [#allocation6]   ;;  %s356_s27 = scalar_lea.hbm %s486_s1, 256 }
  0x14   :  { %s27_s24 = sshll.u32 %s409_s23, 4  ;;  %p357_p8 = scmp.ne.s32.totalorder %s486_s1, %s356_s27  ;;  %s28_s24 = int_to_ptr.vmem [resolvable:$true] %s27_s24 }
  0x15   :  { %p360_p9 = scmp.lt.u32.totalorder %s356_s27, %s486_s1 }
  0x17   :  { %p362_p10 = pnand %p360_p9, %p357_p8 }
  0x19   :  { %365 = shalt.err (!%p362_p10)
}
  0x1a   :  { %s366_s4 = scalar_lea.vmem %s28_s24, 256  ;;  %p371_p12 = scmp.lt.s32.totalorder %s28_s24, %s28_s24 }
  0x1b   :  { %p367_p11 = scmp.ne.s32.totalorder %s28_s24, %s366_s4  ;;  %p372_p13 = scmp.lt.s32.totalorder %s366_s4, %s366_s4 }
  0x1d   :  { %p373_p0 = por %p372_p13, %p371_p12 }
  0x1f   :  { %p374_p1 = pnand %p373_p0, %p367_p11 }
  0x21   :  { %377 = shalt.err (!%p374_p1)
}
  0x22   :  { %s410_s0 = smov 128   ;;  %s411_s5 = smov 8  }
  0x23   :  { %33 = dma.hbm_to_vmem [thread:$0]  %s486_s1, 256, %s28_s24, [#allocation7], %s410_s0, %s410_s0, %s411_s5  }
  0x24   :  { %400 = dma.done.wait [#allocation4], 128  }
  0x25   :  { %401 = vsyncadd [#allocation4], 4294967168 }
  0x26   :  { %402 = dma.done.wait [#allocation7], 256  }
  0x27   :  { %403 = vsyncadd [#allocation7], 4294967040  ;;  %v412_v0 = vmov 0.0   ;;  %v93_v1 = vld [vmem:[#allocation3 + $0x4] sm:$0xf]  ;;  %s413_s1 = smov 16   ;;  %v50_v20 = vlaneseq }
  0x28   :  { %43 = vst [vmem:[#allocation2 + $0x18] sm:$0xff] %v412_v0  ;;  %40 = vst [vmem:[#allocation2] sm:$0xff] %v412_v0  ;;  %264 = vmatprep.mubr.f32.mxu0 %v412_v0  ;;  %270 = vmatprep.mubr.f32.mxu1 %v412_v0  ;;  %v65_v2 = vld [vmem:[#allocation3 + $0x4] sm:$0xf]  ;;  %s414_s8 = smov 32   ;;  %s415_s9 = smov 24  }
  0x29   :  { %41 = vst [vmem:[#allocation2 + $0x8] sm:$0xff] %v412_v0  ;;  %42 = vst [vmem:[#allocation2 + $0x10] sm:$0xff] %v412_v0  ;;  %v107_v3 = vld [vmem:[#allocation3 + $0x4] sm:$0xf]  ;;  %95 = vrot.lane.b32.xlu1 %v93_v1, %s413_s1  ;;  %67 = vrot.lane.b32.xlu0 %v65_v2, %s414_s8  ;;  %v57_v5 = vld [vmem:[#allocation3] sm:$0xf] }
  0x2a   :  { %44 = vst [vmem:[#allocation2 + $0x20] sm:$0xff] %v412_v0  ;;  %45 = vst [vmem:[#allocation2 + $0x28] sm:$0xff] %v412_v0  ;;  %v109_v4 = vrot.slane %v107_v3, 4  ;;  %v71_v6 = vld [vmem:[#allocation3] sm:$0xf]  ;;  %vm52_vm0 = vcmp.lt.s32.totalorder %v50_v20, 256 }
  0x2b   :  { %46 = vst [vmem:[#allocation2 + $0x30] sm:$0xff] %v412_v0  ;;  %47 = vst [vmem:[#allocation2 + $0x38] sm:$0xff] %v412_v0  ;;  %v79_v7 = vld [vmem:[#allocation3 + $0x4] sm:$0xf]  ;;  %v73_v8 = vrot.slane %v71_v6, 4  ;;  %s416_s10 = smov 112  }
  0x2c   :  { %48 = vst [vmem:[#allocation2 + $0x40] sm:$0x1f] %v412_v0  ;;  %49 = vst [vmem:[#allocation2 + $0x48] sm:$0x1f] %v412_v0  ;;  %v81_v9 = vrot.slane %v79_v7, 4  ;;  %s417_s11 = smov 120  }
  0x2d   :  { %110 = vrot.lane.b32.xlu1 %v109_v4, %s411_s5  ;;  %59 = vrot.lane.b32.xlu0 %v57_v5, %s414_s8  ;;  %v99_v10 = vld [vmem:[#allocation3] sm:$0xf]  ;;  %v116_v11 = vld [vmem:[#allocation3 + $0x4] sm:$0xf]  ;;  %v418_v23 = vmov 1.0   ;;  %s419_s12 = smov 104  }
  0x2e   :  { %v114_v12 = vld [vmem:[#allocation3] sm:$0xf]  ;;  %117 = vst [vmem:[#allocation2 + $0x28] sm:$0xf] %v116_v11  ;;  %v101_v13 = vrot.slane %v99_v10, 4  ;;  %s420_s13 = smov 96  }
  0x2f   :  { %115 = vst [vmem:[#allocation2 + $0x20] sm:$0xf] %v114_v12  ;;  %v86_v14 = vld [vmem:[#allocation3] sm:$0xf]  ;;  %v126_v15 = vld [vmem:[#allocation3 + $0x4] sm:$0xf] }
  0x30   :  { %v128_v16 = vrot.slane %v126_v15, 4  ;;  %v140_v17 = vld [vmem:[#allocation3 + $0x4] sm:$0xf]  ;;  %v118_v18 = vld [vmem:[#allocation3] sm:$0xf]  ;;  %vm91_vm1 = vcmask 1043584  }
  0x31   :  { %74 = vrot.lane.b32.xlu1 %v73_v8, %s415_s9  ;;  %82 = vrot.lane.b32.xlu0 %v81_v9, %s415_s9  ;;  %v154_v19 = vld [vmem:[#allocation3 + $0x4] sm:$0xf]  ;;  %v120_v21 = vrot.slane %v118_v18, 4  ;;  %55 = vst.msk [vmem:[#allocation2 + $0x44] ss:$8 sm:$0x3] %vm52_vm0, %v418_v23 }
  0x32   :  { %v156_v22 = vrot.slane %v154_v19, 4  ;;  %v146_v24 = vld [vmem:[#allocation3] sm:$0xf]  ;;  %v168_v27 = vld [vmem:[#allocation3 + $0x4] sm:$0xf]  ;;  %vm62_vm2 = vcmask 1043712  }
  0x33   :  { %v148_v25 = vrot.slane %v146_v24, 4  ;;  %v133_v26 = vld [vmem:[#allocation3] sm:$0xf]  ;;  %vm105_vm3 = vcmask 1047620   ;;  %vm77_vm4 = vcmask 1047748   ;;  %vm138_vm5 = vcmask 912384  }
  0x34   :  { %v161_v28 = vld [vmem:[#allocation3] sm:$0xf]  ;;  %vm124_vm6 = vcmask 982020   ;;  %vm152_vm7 = vcmask 850948   ;;  %vm166_vm8 = vcmask 781312   ;;  %vm193_vm9 = vcmask 1044480  }
  0x35   :  { %102 = vrot.lane.b32.xlu1 %v101_v13, %s411_s5  ;;  %88 = vrot.lane.b32.xlu0 %v86_v14, %s413_s1  ;;  %v174_v59 = vld [vmem:[#allocation6] sm:$0xff]  ;;  %vm186_vm10 = vcmask 302080   ;;  %v175_v60 = vld [vmem:[#allocation6 + $0x8] sm:$0xff]  ;;  %s421_s14 = smov [#allocation8]  }
  0x36   :  { %s287_s15 = sshll.u32 %s421_s14, 4  ;;  %s288_s15 = int_to_ptr.vmem [resolvable:$true] %s287_s15 }
  0x37   :  { %s378_s16 = scalar_lea.vmem %s288_s15, 512  ;;  %p383_p3 = scmp.lt.s32.totalorder %s288_s15, %s288_s15 }
  0x38   :  { %p379_p2 = scmp.ne.s32.totalorder %s288_s15, %s378_s16  ;;  %p384_p4 = scmp.lt.s32.totalorder %s378_s16, %s378_s16 }
  0x39   :  { %142 = vrot.lane.b32.xlu1 %v140_v17, %s416_s10  ;;  %129 = vrot.lane.b32.xlu0 %v128_v16, %s417_s11 }
  0x3a   :  { %p385_p5 = por %p384_p4, %p383_p3 }
  0x3c   :  { %p386_p6 = pnand %p385_p5, %p379_p2 }
  0x3d   :  { %121 = vrot.lane.b32.xlu1 %v120_v21, %s417_s11  ;;  %157 = vrot.lane.b32.xlu0 %v156_v22, %s419_s12 }
  0x41   :  { %149 = vrot.lane.b32.xlu1 %v148_v25, %s419_s12  ;;  %135 = vrot.lane.b32.xlu0 %v133_v26, %s416_s10 }
  0x45   :  { %170 = vrot.lane.b32.xlu0 %v168_v27, %s420_s13  ;;  %163 = vrot.lane.b32.xlu1 %v161_v28, %s420_s13 }
  0x9b   :  { %v96_v29 = vpop.permute.xlu1 %95  ;;  %v68_v30 = vpop.permute.xlu0 %67 }
  0x9c   :  { %98 = vst.msk [vmem:[#allocation2 + $0x18] sm:$0xf] %vm91_vm1, %v96_v29 }
  0x9d   :  { %70 = vst.msk [vmem:[#allocation2 + $0x8] sm:$0xf] %vm62_vm2, %v68_v30 }
  0x9f   :  { %v111_v31 = vpop.permute.xlu1 %110  ;;  %v60_v32 = vpop.permute.xlu0 %59 }
  0xa0   :  { %113 = vst.msk [vmem:[#allocation2 + $0x18] sm:$0xf0] %vm105_vm3, %v111_v31 }
  0xa1   :  { %63 = vst.msk [vmem:[#allocation2] sm:$0xf] %vm62_vm2, %v60_v32 }
  0xa3   :  { %v75_v33 = vpop.permute.xlu1 %74  ;;  %v83_v34 = vpop.permute.xlu0 %82 }
  0xa4   :  { %78 = vst.msk [vmem:[#allocation2] sm:$0xf0] %vm77_vm4, %v75_v33  ;;  %85 = vst.msk [vmem:[#allocation2 + $0x8] sm:$0xf0] %vm77_vm4, %v83_v34 }
  0xa7   :  { %v103_v35 = vpop.permute.xlu1 %102  ;;  %v89_v36 = vpop.permute.xlu0 %88  ;;  %v179_v40 = vld [vmem:[#allocation2 + $0x18] sm:$0xff] }
  0xa8   :  { %106 = vst.msk [vmem:[#allocation2 + $0x10] sm:$0xf0] %vm105_vm3, %v103_v35 }
  0xa9   :  { %92 = vst.msk [vmem:[#allocation2 + $0x10] sm:$0xf] %vm91_vm1, %v89_v36 }
  0xab   :  { %v143_v37 = vpop.permute.xlu1 %142  ;;  %v130_v38 = vpop.permute.xlu0 %129  ;;  %v177_v39 = vld [vmem:[#allocation2 + $0x8] sm:$0xff]  ;;  %v176_v44 = vld [vmem:[#allocation2] sm:$0xff] }
  0xac   :  { %145 = vst.msk [vmem:[#allocation2 + $0x38] sm:$0xf] %vm138_vm5, %v143_v37  ;;  %v304_v41 = vpack.c.bf16 %v179_v40, %v177_v39 }
  0xad   :  { %132 = vst.msk [vmem:[#allocation2 + $0x28] sm:$0xf0] %vm124_vm6, %v130_v38 }
  0xae   :  { %305 = vmatprep.subr.bf16.mxu0 %v304_v41  ;;  %312 = vmatprep.subr.bf16.mxu1 %v304_v41 }
  0xaf   :  { %v122_v42 = vpop.permute.xlu1 %121  ;;  %v158_v43 = vpop.permute.xlu0 %157 }
  0xb0   :  { %v178_v45 = vld [vmem:[#allocation2 + $0x10] sm:$0xff]  ;;  %125 = vst.msk [vmem:[#allocation2 + $0x20] sm:$0xf0] %vm124_vm6, %v122_v42 }
  0xb1   :  { %160 = vst.msk [vmem:[#allocation2 + $0x38] sm:$0xf0] %vm152_vm7, %v158_v43  ;;  %v306_v46 = vpack.c.bf16 %v178_v45, %v176_v44 }
  0xb3   :  { %307 = vmatpush1.bf16.msra.mxu0 %v306_v46  ;;  %315 = vmatpush1.bf16.msra.mxu1 %v306_v46  ;;  %v150_v47 = vpop.permute.xlu1 %149  ;;  %v136_v48 = vpop.permute.xlu0 %135 }
  0xb4   :  { %153 = vst.msk [vmem:[#allocation2 + $0x30] sm:$0xf0] %vm152_vm7, %v150_v47  ;;  %v181_v51 = vld [vmem:[#allocation2 + $0x28] sm:$0xff] }
  0xb5   :  { %139 = vst.msk [vmem:[#allocation2 + $0x30] sm:$0xf] %vm138_vm5, %v136_v48 }
  0xb7   :  { %v171_v49 = vpop.permute.xlu0 %170  ;;  %v164_v50 = vpop.permute.xlu1 %163  ;;  %v180_v54 = vld [vmem:[#allocation2 + $0x20] sm:$0xff] }
  0xb8   :  { %v183_v52 = vld [vmem:[#allocation2 + $0x38] sm:$0xff]  ;;  %173 = vst.msk [vmem:[#allocation2 + $0x48] sm:$0xf] %vm166_vm8, %v171_v49  ;;  %167 = vst.msk [vmem:[#allocation2 + $0x40] sm:$0xf] %vm166_vm8, %v164_v50 }
  0xb9   :  { %v308_v53 = vpack.c.bf16 %v183_v52, %v181_v51 }
  0xbb   :  { %309 = vmatprep.subr.bf16.mxu0 %v308_v53  ;;  %313 = vmatprep.subr.bf16.mxu1 %v308_v53 }
  0xbc   :  { %v182_v55 = vld [vmem:[#allocation2 + $0x30] sm:$0xff] }
  0xbd   :  { %v310_v56 = vpack.c.bf16 %v182_v55, %v180_v54 }
  0xbf   :  { %311 = vmatpush1.bf16.msra.mxu0 %v310_v56  ;;  %316 = vmatpush1.bf16.msra.mxu1 %v310_v56  ;;  %v185_v57 = vld [vmem:[#allocation2 + $0x48] sm:$0x1f]  ;;  %v184_v58 = vld [vmem:[#allocation2 + $0x40] sm:$0x1f] }
  0xc0   :  { %300 = vmatprep.subr.msk.mxu0 %vm193_vm9, %v185_v57  ;;  %314 = vmatprep.subr.msk.mxu1 %vm193_vm9, %v185_v57 }
  0xc3   :  { %301 = vmatpush1.msk.msra.mxu0 %vm193_vm9, %v184_v58  ;;  %317 = vmatpush1.msk.msra.mxu1 %vm193_vm9, %v184_v58 }
  0xc4   :  { %302 = vmatmul.mubr.msk.f32.vlgmr.msra.gmra.mrb[0].mxu0 %vm186_vm10, %v174_v59  ;;  %303 = vmatmul.mubr.msk.f32.vlgmr.msra.gmra.mrb[0].mxu1 %vm186_vm10, %v175_v60 }
 0x197   :  { %v266_v61 = vpop.f32.mrb[0].mxu0  ;;  %v272_v62 = vpop.f32.mrb[0].mxu1 }
 0x198   :  { %277 = vst [vmem:[#allocation8] sm:$0xff] %v266_v61  ;;  %278 = vst [vmem:[#allocation8 + $0x8] sm:$0xff] %v272_v62  ;;  %v268_v63 = vpop.f32.mrb[1].mxu0  ;;  %v274_v0 = vpop.f32.mrb[1].mxu1 }
 0x199   :  { %280 = vst [vmem:[#allocation8 + $0x10] sm:$0xff] %v268_v63  ;;  %281 = vst [vmem:[#allocation8 + $0x18] sm:$0xff] %v274_v0 }
 0x19a   :  { %389 = shalt.err (!%p386_p6)
}
 0x19b   :  { %s390_s19 = scalar_lea.hbm %s487_s2, 512 }
 0x19c   :  { %p391_p7 = scmp.ne.s32.totalorder %s487_s2, %s390_s19  ;;  %p394_p8 = scmp.lt.u32.totalorder %s390_s19, %s487_s2 }
 0x19e   :  { %p396_p9 = pnand %p394_p8, %p391_p7 }
 0x1a0   :  { %399 = shalt.err (!%p396_p9)
}
 0x1a1   :  { %293 = dma.vmem_to_hbm [thread:$0]  %s288_s15, 512, %s487_s2, [#allocation5], %s410_s0, %s410_s0, %s411_s5  }
 0x1a2   :  { %404 = dma.done.wait [#allocation5], 512  }
 0x1a3   :  { %405 = vsyncadd [#allocation5], 4294966784 }
 0x1a4   :  { %297 = vsyncpa [#allocation4], 1 }
 0x1a5   :  { %298 = vsyncpa [#allocation7], 1 }
 0x1a6   :  { %299 = vsyncpa [#allocation5], 1 }

</bundles_post_ra>
